<compile_context>
chip_gen: v5e
topology: v5e:2x2
jax: 0.10.0
libtpu: 0.0.40
codegen_flags: <defaults>
</compile_context>

<pallas_src>
import functools

import jax
import jax.numpy as jnp
from jax import lax
from jax.experimental import pallas as pl
from jax.experimental.pallas import tpu as pltpu


# ----------------------------- helpers -------------------------------------- #

_LANE = 128
_SUBLANE = 8
_WORKSET_BYTES = 20 << 20   # double-buffered input working set target (fits all chips)


def _round_up(x, m):
    return ((x + m - 1) // m) * m


def _padded_row_bytes(n_cols, itemsize):
    """VMEM bytes one logical row occupies once lanes are padded to 128."""
    return _round_up(int(n_cols), _LANE) * max(int(itemsize), 1)


def _choose_block_rows(n_rows, per_row_padded_bytes):
    """Biggest row-block (multiple of 8) whose 2x double-buffered (preds+trues)
    footprint stays inside the working-set budget on v5e/v6e/v7x."""
    rows = _WORKSET_BYTES // max(2 * int(per_row_padded_bytes), 1)
    rows = max(_SUBLANE, (rows // _SUBLANE) * _SUBLANE)
    if n_rows <= rows:
        return int(n_rows)          # full-extent block is always layout-legal
    return int(rows)


def _num_tensorcores():
    """2 on v7x (two TensorCores per chip), 1 on v5e/v6e. Conservative fallback."""
    try:
        kind = jax.local_devices()[0].device_kind.lower()
    except Exception:
        return 1
    return 2 if "v7" in kind else 1


# ----------------------------- kernels -------------------------------------- #

def _argmax_count_kernel(preds_ref, trues_ref, out_ref, acc_ref, *,
                         n_rows, blk_n, blocks_per_split):
    """Per-block: native-dtype argmax over classes, compare to labels, accumulate."""
    s = pl.program_id(0)          # TensorCore split
    j = pl.program_id(1)          # row-block within split (reduction axis)

    @pl.when(j == 0)
    def _init():
        acc_ref[...] = jnp.zeros_like(acc_ref)

    p = preds_ref[...]                                  # (blk_n, C), native dtype
    t = trues_ref[...]                                  # (blk_n, 1), int32
    c = p.shape[1]

    # First-occurrence argmax: max value, then min class index achieving it.
    max_val = jnp.max(p, axis=1, keepdims=True)                    # (blk_n, 1)
    cls_idx = lax.broadcasted_iota(jnp.int32, p.shape, 1)          # (blk_n, C)
    argmax = jnp.min(jnp.where(p == max_val, cls_idx, jnp.int32(c)),
                     axis=1, keepdims=True)                        # (blk_n, 1)

    # Global row mask (handles ragged last block and clamped overshoot blocks).
    row0 = (s * blocks_per_split + j) * blk_n
    rows = row0 + lax.broadcasted_iota(jnp.int32, (blk_n, 1), 0)
    valid = rows < n_rows

    correct = jnp.where(valid & (argmax == t), jnp.int32(1), jnp.int32(0))
    acc_ref[...] += jnp.sum(correct, axis=0, keepdims=True)        # sublane-only reduce

    @pl.when(j == blocks_per_split - 1)
    def _finalize():
        total = jnp.sum(acc_ref[...])
        out_ref[...] = jnp.full(out_ref.shape, total, dtype=jnp.int32)


def _binary_count_kernel(preds_ref, trues_ref, out_ref, acc_ref, *,
                         n_elems, lane_width, blk_n, blocks_per_split):
    """Per-block: threshold at 0.5, elementwise compare on a lane-dense slab."""
    s = pl.program_id(0)
    j = pl.program_id(1)

    @pl.when(j == 0)
    def _init():
        acc_ref[...] = jnp.zeros_like(acc_ref)

    p = preds_ref[...].astype(jnp.float32)              # (blk_n, lane_width)
    t = trues_ref[...].astype(jnp.float32)              # (blk_n, lane_width)

    # torch: (preds >= 0.5) == trues  -- bool promotes to 0.0/1.0 before compare.
    pred01 = jnp.where(p >= jnp.float32(0.5), jnp.float32(1.0), jnp.float32(0.0))
    match = pred01 == t

    # Global element mask (handles tail padding and clamped overshoot blocks).
    row0 = (s * blocks_per_split + j) * blk_n
    rows = row0 + lax.broadcasted_iota(jnp.int32, (blk_n, lane_width), 0)
    lanes = lax.broadcasted_iota(jnp.int32, (blk_n, lane_width), 1)
    elem = rows * lane_width + lanes
    valid = elem < n_elems

    correct = jnp.where(valid & match, jnp.int32(1), jnp.int32(0))
    acc_ref[...] += jnp.sum(correct, axis=0, keepdims=True)        # (1, lane_width)

    @pl.when(j == blocks_per_split - 1)
    def _finalize():
        total = jnp.sum(acc_ref[...])
        out_ref[...] = jnp.full(out_ref.shape, total, dtype=jnp.int32)


# ----------------------------- launcher -------------------------------------- #

def _launch(kernel_body, preds2d, trues2d, blk_n, acc_lanes, extra_kwargs, denom):
    n_rows2d, n_cols_p = preds2d.shape
    n_cols_t = trues2d.shape[1]

    total_blocks = pl.cdiv(n_rows2d, blk_n)
    # 2-way split only on chips with 2 TensorCores (v7x); a serial loop otherwise.
    n_splits = 2 if (_num_tensorcores() >= 2 and total_blocks >= 2) else 1
    blocks_per_split = pl.cdiv(total_blocks, n_splits)
    max_block = total_blocks - 1

    def in_map(s, j):
        # Clamp overshoot blocks to stay in-bounds; their rows are masked in-kernel.
        return (jnp.minimum(s * blocks_per_split + j, max_block), 0)

    def out_map(s, j):
        return (s, 0, 0)

    kernel = functools.partial(kernel_body, blk_n=blk_n,
                               blocks_per_split=blocks_per_split, **extra_kwargs)

    # VMEM accounting with lane padding (what the blocks physically occupy).
    preds_blk = blk_n * _padded_row_bytes(n_cols_p, preds2d.dtype.itemsize)
    trues_blk = blk_n * _padded_row_bytes(n_cols_t, trues2d.dtype.itemsize)
    out_bytes = n_splits * _SUBLANE * _LANE * 4
    acc_bytes = _SUBLANE * _round_up(acc_lanes, _LANE) * 4
    vmem_limit = int(min(
        64 << 20,
        max(8 << 20,
            2 * (preds_blk + trues_blk) + out_bytes + acc_bytes + (4 << 20))))

    cost = pl.CostEstimate(
        flops=int(preds2d.size),
        transcendentals=0,
        bytes_accessed=int(preds2d.size * preds2d.dtype.itemsize
                           + trues2d.size * trues2d.dtype.itemsize
                           + out_bytes),
    )

    counts = pl.pallas_call(
        kernel,
        out_shape=jax.ShapeDtypeStruct((n_splits, _SUBLANE, _LANE), jnp.int32),
        grid_spec=pltpu.PrefetchScalarGridSpec(
            num_scalar_prefetch=0,
            grid=(n_splits, blocks_per_split),
            in_specs=[
                pl.BlockSpec((blk_n, n_cols_p), in_map),
                pl.BlockSpec((blk_n, n_cols_t), in_map),
            ],
            out_specs=pl.BlockSpec((1, _SUBLANE, _LANE), out_map),
            scratch_shapes=[pltpu.VMEM((1, acc_lanes), jnp.int32)],
        ),
        compiler_params=pltpu.CompilerParams(
            dimension_semantics=("parallel", "arbitrary"),
            vmem_limit_bytes=vmem_limit,
        ),
        cost_estimate=cost,
    )(preds2d, trues2d)

    total = jnp.sum(counts[:, 0, 0])          # exact int32 count
    return total.astype(jnp.float32) / jnp.float32(denom)


def accuracy(preds, trues, *, binary=False):
    """Pallas-backed equivalent of Accuracy(binary=...).forward(preds, trues)."""
    if binary:
        # Lane-dense slab: flatten, tail-pad to a multiple of 8*128, view as
        # (rows, 1024). Padded tail elements are masked by global element index.
        lane_width = _SUBLANE * _LANE          # 1024
        flat_p = preds.reshape(-1)
        flat_t = trues.reshape(-1)
        assert flat_p.shape == flat_t.shape
        n_elems = int(flat_p.size)
        pad = (-n_elems) % lane_width
        if pad:
            flat_p = jnp.pad(flat_p, (0, pad))
            flat_t = jnp.pad(flat_t, (0, pad))
        preds2d = flat_p.reshape(-1, lane_width)
        trues2d = flat_t.reshape(-1, lane_width)

        per_row = (_padded_row_bytes(lane_width, preds2d.dtype.itemsize)
                   + _padded_row_bytes(lane_width, trues2d.dtype.itemsize))
        blk_n = _choose_block_rows(preds2d.shape[0], per_row)
        return _launch(_binary_count_kernel, preds2d, trues2d, blk_n,
                       acc_lanes=lane_width,
                       extra_kwargs=dict(n_elems=n_elems, lane_width=lane_width),
                       denom=n_elems)
    else:
        assert preds.ndim == 2, "multiclass path expects (N, C) preds"
        n_rows, n_classes = preds.shape
        trues2d = trues.reshape(n_rows, 1).astype(jnp.int32)

        per_row = (_padded_row_bytes(n_classes, preds.dtype.itemsize)
                   + _padded_row_bytes(1, 4))
        blk_n = _choose_block_rows(n_rows, per_row)
        # TODO(synk): for vocab-sized C where even an 8-row (8, C) block exceeds the
        # VMEM budget, add an inner 'arbitrary' C-tile axis carrying a running
        # (max, argmax) pair (online argmax with min-index tie-break).
        return _launch(_argmax_count_kernel, preds, trues2d, blk_n,
                       acc_lanes=1,
                       extra_kwargs=dict(n_rows=n_rows),
                       denom=n_rows)


# ----------------------------- demo / check --------------------------------- #

if __name__ == "__main__":
    key = jax.random.PRNGKey(0)
    k1, k2, k3, k4 = jax.random.split(key, 4)

    # ---- multiclass path: preds (N, C) logits, trues (N,) int labels ----
    N, C = 8, 32
    preds_mc = jax.random.normal(k1, (N, C), dtype=jnp.float32)
    trues_mc = jax.random.randint(k2, (N,), 0, C, dtype=jnp.int32)

    acc_mc = accuracy(preds_mc, trues_mc, binary=False)
    jax.block_until_ready(acc_mc)

    ref_mc = (jnp.argmax(preds_mc, axis=1) == trues_mc).astype(jnp.float32).mean()
    assert jnp.allclose(acc_mc, ref_mc), (acc_mc, ref_mc)

    # ---- binary path (2-D): preds (N, D) probabilities, trues (N, D) {0,1} ----
    D = 16
    preds_bin = jax.random.uniform(k3, (N, D), dtype=jnp.float32)
    trues_bin = (jax.random.uniform(k4, (N, D)) >= 0.5).astype(jnp.float32)

    acc_bin = accuracy(preds_bin, trues_bin, binary=True)
    jax.block_until_ready(acc_bin)

    ref_bin = ((preds_bin >= 0.5).astype(jnp.float32) == trues_bin).astype(jnp.float32).mean()
    assert jnp.allclose(acc_bin, ref_bin), (acc_bin, ref_bin)

    # ---- binary path (1-D): exercises the lane-dense flatten/pad path ----
    preds_1d = jax.random.uniform(k1, (37,), dtype=jnp.float32)
    trues_1d = (jax.random.uniform(k2, (37,)) >= 0.5).astype(jnp.float32)

    acc_1d = accuracy(preds_1d, trues_1d, binary=True)
    jax.block_until_ready(acc_1d)

    ref_1d = ((preds_1d >= 0.5).astype(jnp.float32) == trues_1d).astype(jnp.float32).mean()
    assert jnp.allclose(acc_1d, ref_1d), (acc_1d, ref_1d)

    print("KERNEL_OK")
</pallas_src>

<mosaic_0001>
module attributes {stable_mosaic.version = 11 : i64} {
  func.func @_argmax_count_kernel(%arg0: i32, %arg1: i32, %arg2: memref<8x32xf32, #tpu.memory_space<vmem>>, %arg3: memref<8x1xi32, #tpu.memory_space<vmem>>, %arg4: memref<1x8x128xi32, #tpu.memory_space<vmem>>, %arg5: memref<1x1xi32, #tpu.memory_space<vmem>>) attributes {dimension_semantics = [#tpu.dimension_semantics<parallel>, #tpu.dimension_semantics<arbitrary>], iteration_bounds = array<i64: 1, 1>, scalar_prefetch = 0 : i64, scratch_operands = 1 : i64, tpu.core_type = #tpu.core_type<tc>, window_params = [{transform_indices = @transform_0, window_bounds = array<i64: 8, 32>}, {transform_indices = @transform_1, window_bounds = array<i64: 8, 1>}, {transform_indices = @transform_2, window_bounds = array<i64: 1, 8, 128>}]} {
    %c0_i32 = arith.constant 0 : i32
    %0 = arith.cmpi eq, %arg1, %c0_i32 : i32
    %1 = arith.extui %0 : i1 to i32
    %c0_i32_0 = arith.constant 0 : i32
    %2 = arith.cmpi ne, %1, %c0_i32_0 : i32
    scf.if %2 {
      %c0_i32_15 = arith.constant 0 : i32
      %35 = vector.broadcast %c0_i32_15 : i32 to vector<1x1xi32>
      %c0_16 = arith.constant 0 : index
      %c0_17 = arith.constant 0 : index
      %36 = vector.load %arg5[%c0_16, %c0_17] : memref<1x1xi32, #tpu.memory_space<vmem>>, vector<1x1xi32>
      tpu.vector_store %arg5[%c0_16, %c0_17], %35 {strides = array<i32>} : memref<1x1xi32, #tpu.memory_space<vmem>>, vector<1x1xi32>,
    } else {
    }
    %c0 = arith.constant 0 : index
    %c0_1 = arith.constant 0 : index
    %3 = vector.load %arg2[%c0, %c0_1] : memref<8x32xf32, #tpu.memory_space<vmem>>, vector<8x32xf32>
    %c0_2 = arith.constant 0 : index
    %c0_3 = arith.constant 0 : index
    %4 = vector.load %arg3[%c0_2, %c0_3] : memref<8x1xi32, #tpu.memory_space<vmem>>, vector<8x1xi32>
    %cst = arith.constant dense<0xFF800000> : vector<8xf32>
    %5 = vector.multi_reduction <maximumf>, %3, %cst [1] : vector<8x32xf32> to vector<8xf32>
    %6 = vector.shape_cast %5 : vector<8xf32> to vector<8x1xf32>
    %7 = tpu.iota {dimensions = array<i32: 1>} : vector<8x32xi32>
    %8 = vector.broadcast %6 : vector<8x1xf32> to vector<8x32xf32>
    %9 = arith.cmpf oeq, %3, %8 : vector<8x32xf32>
    %c32_i32 = arith.constant 32 : i32
    %10 = vector.broadcast %c32_i32 : i32 to vector<8x32xi32>
    %11 = arith.select %9, %7, %10 : vector<8x32xi1>, vector<8x32xi32>
    %cst_4 = arith.constant dense<2147483647> : vector<8xi32>
    %12 = vector.multi_reduction <minsi>, %11, %cst_4 [1] : vector<8x32xi32> to vector<8xi32>
    %13 = vector.shape_cast %12 : vector<8xi32> to vector<8x1xi32>
    %c1_i32 = arith.constant 1 : i32
    %14 = arith.muli %arg0, %c1_i32 : i32
    %15 = arith.addi %14, %arg1 : i32
    %c8_i32 = arith.constant 8 : i32
    %16 = arith.muli %15, %c8_i32 : i32
    %17 = tpu.iota {dimensions = array<i32: 0>} : vector<8x1xi32>
    %18 = vector.broadcast %16 : i32 to vector<8x1xi32>
    %19 = arith.addi %18, %17 : vector<8x1xi32>
    %c8_i32_5 = arith.constant 8 : i32
    %20 = vector.broadcast %c8_i32_5 : i32 to vector<8x1xi32>
    %21 = arith.cmpi slt, %19, %20 : vector<8x1xi32>
    %22 = arith.cmpi eq, %13, %4 : vector<8x1xi32>
    %23 = arith.andi %21, %22 : vector<8x1xi1>
    %c1_i32_6 = arith.constant 1 : i32
    %c0_i32_7 = arith.constant 0 : i32
    %24 = vector.broadcast %c1_i32_6 : i32 to vector<8x1xi32>
    %25 = vector.broadcast %c0_i32_7 : i32 to vector<8x1xi32>
    %26 = arith.select %23, %24, %25 : vector<8x1xi1>, vector<8x1xi32>
    %c0_8 = arith.constant 0 : index
    %c0_9 = arith.constant 0 : index
    %27 = vector.load %arg5[%c0_8, %c0_9] : memref<1x1xi32, #tpu.memory_space<vmem>>, vector<1x1xi32>
    %cst_10 = arith.constant dense<0> : vector<1xi32>
    %28 = vector.multi_reduction <add>, %26, %cst_10 [0] : vector<8x1xi32> to vector<1xi32>
    %29 = vector.shape_cast %28 : vector<1xi32> to vector<1x1xi32>
    %30 = arith.addi %27, %29 : vector<1x1xi32>
    %c0_11 = arith.constant 0 : index
    %c0_12 = arith.constant 0 : index
    %31 = vector.load %arg5[%c0_11, %c0_12] : memref<1x1xi32, #tpu.memory_space<vmem>>, vector<1x1xi32>
    tpu.vector_store %arg5[%c0_11, %c0_12], %30 {strides = array<i32>} : memref<1x1xi32, #tpu.memory_space<vmem>>, vector<1x1xi32>,
    %c0_i32_13 = arith.constant 0 : i32
    %32 = arith.cmpi eq, %arg1, %c0_i32_13 : i32
    %33 = arith.extui %32 : i1 to i32
    %c0_i32_14 = arith.constant 0 : i32
    %34 = arith.cmpi ne, %33, %c0_i32_14 : i32
    scf.if %34 {
      %c0_15 = arith.constant 0 : index
      %c0_16 = arith.constant 0 : index
      %35 = vector.load %arg5[%c0_15, %c0_16] : memref<1x1xi32, #tpu.memory_space<vmem>>, vector<1x1xi32>
      %36 = vector.shape_cast %35 : vector<1x1xi32> to vector<1x1x1xi32>
      %cst_17 = arith.constant dense<0> : vector<1xi32>
      %37 = vector.multi_reduction <add>, %36, %cst_17 [1, 2] : vector<1x1x1xi32> to vector<1xi32>
      %38 = vector.shape_cast %37 : vector<1xi32> to vector<1x1x1xi32>
      %39 = vector.extract %38[0, 0, 0] : i32 from vector<1x1x1xi32>
      %40 = vector.broadcast %39 : i32 to vector<1x8x128xi32>
      %c0_18 = arith.constant 0 : index
      %c0_19 = arith.constant 0 : index
      %c0_20 = arith.constant 0 : index
      %41 = vector.load %arg4[%c0_18, %c0_19, %c0_20] : memref<1x8x128xi32, #tpu.memory_space<vmem>>, vector<1x8x128xi32>
      tpu.vector_store %arg4[%c0_18, %c0_19, %c0_20], %40 {strides = array<i32>} : memref<1x8x128xi32, #tpu.memory_space<vmem>>, vector<1x8x128xi32>,
    } else {
    }
    return
  }
  func.func @transform_0(%arg0: i32, %arg1: i32) -> (i32, i32) {
    %c1_i32 = arith.constant 1 : i32
    %0 = arith.muli %arg0, %c1_i32 : i32
    %1 = arith.addi %0, %arg1 : i32
    %c0_i32 = arith.constant 0 : i32
    %2 = arith.minsi %1, %c0_i32 : i32
    %c0_i32_0 = arith.constant 0 : i32
    %c0_i32_1 = arith.constant 0 : i32
    return %2, %c0_i32_0 : i32, i32
  }
  func.func @transform_1(%arg0: i32, %arg1: i32) -> (i32, i32) {
    %c1_i32 = arith.constant 1 : i32
    %0 = arith.muli %arg0, %c1_i32 : i32
    %1 = arith.addi %0, %arg1 : i32
    %c0_i32 = arith.constant 0 : i32
    %2 = arith.minsi %1, %c0_i32 : i32
    %c0_i32_0 = arith.constant 0 : i32
    %c0_i32_1 = arith.constant 0 : i32
    return %2, %c0_i32_0 : i32, i32
  }
  func.func @transform_2(%arg0: i32, %arg1: i32) -> (i32, i32, i32) {
    %c0_i32 = arith.constant 0 : i32
    %c0_i32_0 = arith.constant 0 : i32
    %c0_i32_1 = arith.constant 0 : i32
    return %arg0, %c0_i32, %c0_i32_0 : i32, i32, i32
  }
}

</mosaic_0001>

<bundles_post_ra>
// kernel: tpu_custom_call.1
= control target key start
LH: loop header
LB: loop body
LE: loop exit
PB: predicated region body
PF: predicated region fallthrough
CT: control target
= control target key end

     0   :  { %vm74_vm0 = vcmask 261120   ;;  %s212_s0 = inlined_call_operand.vmem [shape: f32[8,32], index: 0, kind: input, shape index: {}]   ;;  %s213_s1 = inlined_call_operand.vmem [shape: s32[8,1], index: 1, kind: input, shape index: {}]   ;;  %s214_s2 = inlined_call_operand.hbm [shape: s32[1,8,128], index: 2, kind: output, shape index: {}]  }
   0x1   :  { %v72_v0 = vld [vmem:[%s212_s0] sm:$0xff] }
   0x2   :  { %7 = vsyncpa [#allocation4], 0  ;;  %v75_v1 = vsel %vm74_vm0, %v72_v0, -inf  ;;  %v78_v2 = vlaneseq  ;;  %vm70_vm3 = vcmask 0   ;;  %v184_v13 = vmov 0   ;;  %v73_v18 = vld [vmem:[%s213_s1] sm:$0xff] }
   0x3   :  { %76 = vmax.xlane.f32.xlu0 %v75_v1  ;;  %71 = vst.msk [vmem:[#allocation2] sm:$0x1] %vm70_vm3, %v184_v13  ;;  %vm108_vm4 = vcmask 7168   ;;  %s185_s12 = smov [#allocation3]   ;;  %s133_s15 = sshll.u32 %s214_s2, 4  ;;  %s134_s15 = int_to_ptr.hbm [resolvable:$true] %s133_s15 }
   0x4   :  { %v79_v3 = vand.u32 127, %v78_v2  ;;  %s131_s13 = sshll.u32 %s185_s12, 4  ;;  %s132_s13 = int_to_ptr.vmem [resolvable:$true] %s131_s13 }
   0xa   :  { %v107_v27 = vld [vmem:[#allocation2] sm:$0x1] }
  0x76   :  { %v77_v4 = vpop.xlane.xlu0 %76 }
  0x77   :  { %vm80_vm1 = vcmp.eq.f32.partialorder %v72_v0, %v77_v4 }
  0x78   :  { %v81_v5 = vsel %vm80_vm1, %v79_v3, 32 }
  0x79   :  { %v82_v6 = vsel %vm74_vm0, %v81_v5, 2147483647 }
  0x7a   :  { %v84_v7 = vshra.s32 %v82_v6, 16  ;;  %v83_v9 = vand.u32 65535, %v82_v6 }
  0x7c   :  { %v86_v8 = vcvt.s32.f32 %v84_v7  ;;  %v85_v11 = vcvt.s32.f32 %v83_v9 }
  0x7e   :  { %87 = vmin.xlane.f32.xlu0 %v86_v8 }
  0xf1   :  { %v88_v10 = vpop.xlane.xlu0 %87 }
  0xf2   :  { %vm89_vm2 = vcmp.eq.f32.partialorder %v86_v8, %v88_v10  ;;  %v94_v14 = vcvt.f32.s32 %v88_v10 }
  0xf3   :  { %v90_v12 = vsel %vm89_vm2, %v85_v11, inf }
  0xf4   :  { %91 = vmin.xlane.f32.xlu1 %v90_v12  ;;  %v95_v16 = vshll.u32 %v94_v14, 16 }
 0x167   :  { %v92_v15 = vpop.xlane.xlu1 %91 }
 0x168   :  { %v93_v17 = vcvt.f32.s32 %v92_v15 }
 0x16a   :  { %v96_v19 = vadd.s32 %v95_v16, %v93_v17 }
 0x16c   :  { %vm104_vm5 = vcmp.eq.s32.totalorder %v96_v19, %v73_v18 }
 0x16d   :  { %v106_v20 = vsel %vm104_vm5, 1, %v184_v13 }
 0x16e   :  { %v109_v21 = vsel %vm108_vm4, %v106_v20, 0 }
 0x16f   :  { %v110_v22 = vrot.slane %v109_v21, 4 }
 0x171   :  { %v111_v23 = vadd.s32 %v110_v22, %v109_v21 }
 0x173   :  { %v112_v24 = vrot.slane %v111_v23, 2 }
 0x175   :  { %v113_v25 = vadd.s32 %v112_v24, %v111_v23 }
 0x177   :  { %v114_v26 = vrot.slane %v113_v25, 1 }
 0x179   :  { %v115_v28 = vadd.s32 %v114_v26, %v113_v25 }
 0x17b   :  { %v116_v29 = vadd.s32 %v115_v28, %v107_v27 }
 0x17d   :  { %118 = vst.msk [vmem:[#allocation2] sm:$0x1] %vm70_vm3, %v116_v29 }
 0x184   :  { %v122_v30 = vld [vmem:[#allocation2] sm:$0x1] }
 0x185   :  { %154 = vpush %v122_v30 }
 0x1b6   :  { %s155_s16 = spop %154 }
 0x1b7   :  { %v124_v31 = vstv %s155_s16 }
 0x1b8   :  { %125 = vst [vmem:[#allocation3] sm:$0xff] %v124_v31 }
 0x1b9   :  { %136 = dma.vmem_to_hbm [thread:$0]  %s132_s13, 128, %s134_s15, [#allocation4]  }
 0x1ba   :  { %182 = dma.done.wait [#allocation4], 128  }
 0x1bb   :  { %183 = vsyncadd [#allocation4], 4294967168 }
 0x1bc   :  { %141 = vsyncpa [#allocation4], 1 }

</bundles_post_ra>
